<compile_context>
chip_gen: v5e
topology: v5e:2x2
jax: 0.10.0
libtpu: 0.0.40
codegen_flags: <defaults>
</compile_context>

<pallas_src>
import numpy as np
import jax
import jax.numpy as jnp
from jax.experimental import pallas as pl

_BF16 = jnp.bfloat16
_EPS = 1e-5


# ---------------------------------------------------------------------------
# host-side constant builders
# ---------------------------------------------------------------------------
def _interp_matrix(out_size, in_size):
    """1-D interpolation matrix matching F.interpolate(mode='bilinear',
    align_corners=True) along one spatial axis: out = M @ in."""
    m = np.zeros((out_size, in_size), np.float32)
    if out_size == 1 or in_size == 1:
        m[:, 0] = 1.0
        return m
    scale = (in_size - 1) / (out_size - 1)
    for i in range(out_size):
        src = i * scale
        i0 = min(int(np.floor(src)), in_size - 1)
        i1 = min(i0 + 1, in_size - 1)
        f = src - i0
        m[i, i0] += 1.0 - f
        m[i, i1] += f
    return m


def _row_shift_matrix(n, d):
    """S[i_out, i_in] = 1 iff i_in == i_out + d - 1, i.e. (S @ X)[i] = X[i+d-1]
    with zero rows outside [0, n) (3-tap conv shift with pad=1)."""
    s = np.zeros((n, n), np.float32)
    for io in range(n):
        ii = io + d - 1
        if 0 <= ii < n:
            s[io, ii] = 1.0
    return s


def _band_weights(w, W):
    """w: (3, 3, Cin, Cout) -> (3, W*Cin, W*Cout) f32 banded weight matrices.

    The kx taps and the x zero-padding are folded into the band structure
    (kron of a shift matrix with each tap), so each ky tap of the 3x3 conv is
    one full-width matmul on lane-flattened (x*Cin + ci) rows."""
    _, _, Cin, Cout = w.shape
    mats = []
    for dy in range(3):
        m = jnp.zeros((W * Cin, W * Cout), jnp.float32)
        for dx in range(3):
            m = m + jnp.kron(jnp.asarray(_row_shift_matrix(W, dx).T), w[dy, dx])
        mats.append(m)
    return jnp.stack(mats)


# ---------------------------------------------------------------------------
# kernel
# ---------------------------------------------------------------------------
def _bn_relu(acc, g_ref, b_ref, sel_ref, selt_ref, inv_count):
    """Train-mode BatchNorm (biased batch variance, eps=1e-5) + ReLU on a
    lane-dense (N*H, W*Cout) conv output. Per-lane -> per-channel reduction
    and the broadcast back are each ONE small f32 selection matmul."""
    s1 = jnp.sum(acc, axis=0, keepdims=True)                       # (1, W*Cout)
    s2 = jnp.sum(acc * acc, axis=0, keepdims=True)                 # (1, W*Cout)
    sc = jnp.dot(jnp.concatenate([s1, s2], axis=0), sel_ref[...],
                 preferred_element_type=jnp.float32) * inv_count   # (2, Cout)
    mean = sc[0:1]
    var = jnp.maximum(sc[1:2] - mean * mean, 0.0)                  # biased variance
    scale = g_ref[...] * jax.lax.rsqrt(var + _EPS)                 # (1, Cout)
    shift = b_ref[...] - mean * scale                              # (1, Cout)
    ssl = jnp.dot(jnp.concatenate([scale, shift], axis=0), selt_ref[...],
                  preferred_element_type=jnp.float32)              # (2, W*Cout)
    return jnp.maximum(acc * ssl[0:1] + ssl[1:2], 0.0)


def _make_decoder_kernel(depth, count):
    """Fused kernel: bilinear upsample + concat + depth x (conv3x3 -> BN -> ReLU)."""
    inv_count = 1.0 / count

    def kernel(xl_ref, xb_ref, ryn_ref, sh_ref, sel_ref, selt_ref, *rest):
        # xl_ref : (N*h, w*Cl) f32     low-res rows (NHWC lane-flattened)
        # xb_ref : (N*H, W*Cb) f32     skip-connection rows
        # ryn_ref: (3, N*H, N*h) bf16  y-interp pre-composed with the ky shifts
        # sh_ref : (2, N*H, N*H) bf16  exact 0/1 ky shift operators (dy = 0, 2)
        # per block i: w_ref (3*K_i, W*Cout) bf16, gamma (1,Cout), beta (1,Cout)
        # o_ref  : (N*H, W*Cout) f32   lane-dense output
        o_ref = rest[-1]
        blk_refs = [rest[3 * i:3 * i + 3] for i in range(depth)]

        xl = xl_ref[...].astype(_BF16)
        xb = xb_ref[...].astype(_BF16)

        def shift(mat_bf16, v_bf16):
            # rows shifted / interpolated along H with zero padding;
            # exact for the 0/1 shift operators (values are copies of bf16 rows).
            return jnp.dot(mat_bf16, v_bf16,
                           preferred_element_type=jnp.float32).astype(_BF16)

        # ---- block 0: upsample + concat + conv3x3 as ONE K-stacked matmul ----
        w0_ref, g0_ref, b0_ref = blk_refs[0]
        pieces = [shift(ryn_ref[dy], xl) for dy in range(3)]        # y-upsampled + shifted low rows
        pieces += [shift(sh_ref[0], xb), xb, shift(sh_ref[1], xb)]  # shifted skip rows
        xstk = jnp.concatenate(pieces, axis=1)                      # (N*H, 3*(w*Cl + W*Cb))
        acc = jnp.dot(xstk, w0_ref[...], preferred_element_type=jnp.float32)
        y = _bn_relu(acc, g0_ref, b0_ref, sel_ref, selt_ref, inv_count)

        # ---- blocks 1..depth-1: activation stays in VMEM (no HBM round trip) ----
        for w_ref, g_ref, b_ref in blk_refs[1:]:
            yb = y.astype(_BF16)
            xstk = jnp.concatenate([shift(sh_ref[0], yb), yb, shift(sh_ref[1], yb)],
                                   axis=1)                          # (N*H, 3*W*Cout)
            acc = jnp.dot(xstk, w_ref[...], preferred_element_type=jnp.float32)
            y = _bn_relu(acc, g_ref, b_ref, sel_ref, selt_ref, inv_count)

        o_ref[...] = y                                              # lane-dense store

    return kernel


# ---------------------------------------------------------------------------
# Decoder wrapper (convolution='regular', activation='relu', mode='bilinear')
# ---------------------------------------------------------------------------
def init_decoder_params(key, input_channels, output_channels, depth=2):
    blocks = []
    cin = input_channels
    for _ in range(depth):
        key, k1, k2 = jax.random.split(key, 3)
        fan_in = cin * 9
        bound = 1.0 / np.sqrt(fan_in)
        w = jax.random.uniform(k1, (3, 3, cin, output_channels),
                               jnp.float32, -bound, bound)
        b = jax.random.uniform(k2, (1, output_channels),
                               jnp.float32, -bound, bound)
        gamma = jnp.ones((1, output_channels), jnp.float32)   # BN weight init
        beta = jnp.zeros((1, output_channels), jnp.float32)   # BN bias init
        blocks.append(dict(w=w, b=b, gamma=gamma, beta=beta))
        cin = output_channels
    return blocks


def decoder_forward(x_big, x_low, blocks):
    """x_big: (N, C_big, H, W), x_low: (N, C_low, h, w)  (NCHW, like PyTorch)."""
    N, Cb, H, W = x_big.shape
    _, Cl, h, w = x_low.shape
    Cout = blocks[0]["w"].shape[-1]
    depth = len(blocks)
    assert blocks[0]["w"].shape[2] == Cl + Cb
    NH, WCo = N * H, W * Cout

    # NCHW -> lane-dense NHWC rows (one transpose per input, done once)
    xb_rows = jnp.transpose(x_big, (0, 2, 3, 1)).reshape(NH, W * Cb)
    xl_rows = jnp.transpose(x_low, (0, 2, 3, 1)).reshape(N * h, w * Cl)

    # y-interp operator pre-composed with each ky shift (exact f32, cast once)
    ry = _interp_matrix(H, h)                                       # (H, h)
    eye_n = np.eye(N, dtype=np.float32)
    ryn_stack = jnp.asarray(
        np.stack([np.kron(eye_n, _row_shift_matrix(H, dy) @ ry) for dy in range(3)]),
        _BF16)                                                      # (3, N*H, N*h)
    sh_stack = jnp.asarray(
        np.stack([np.kron(eye_n, _row_shift_matrix(H, dy)) for dy in (0, 2)]),
        _BF16)                                                      # (2, N*H, N*H)

    # per-lane <-> per-channel 0/1 selection matrices for the BN reduction (f32)
    sel_np = np.kron(np.ones((W, 1), np.float32), np.eye(Cout, dtype=np.float32))
    sel = jnp.asarray(sel_np)                                       # (W*Cout, Cout)
    selt = jnp.asarray(sel_np.T)                                    # (Cout, W*Cout)

    # block-0 weights: x-interp + channel concat + 3 ky taps all folded into
    # one K-stacked banded matrix (K = 3*(w*Cl + W*Cb)); conv bias dropped
    # (exactly absorbed by the train-mode BatchNorm mean subtraction).
    w0 = blocks[0]["w"]
    rxc = jnp.asarray(np.kron(_interp_matrix(W, w).T,
                              np.eye(Cl, dtype=np.float32)))        # (w*Cl, W*Cl)
    wl_band = _band_weights(w0[:, :, :Cl, :], W)                    # (3, W*Cl, WCo)
    wb_band = _band_weights(w0[:, :, Cl:, :], W)                    # (3, W*Cb, WCo)
    ml = jnp.einsum("ab,dbc->dac", rxc, wl_band)                    # (3, w*Cl, WCo)
    w_stacks = [jnp.concatenate([ml.reshape(3 * w * Cl, WCo),
                                 wb_band.reshape(3 * W * Cb, WCo)],
                                axis=0).astype(_BF16)]              # (3*(wCl+WCb), WCo)
    for blk in blocks[1:]:
        w_stacks.append(_band_weights(blk["w"], W)
                        .reshape(3 * W * Cout, WCo).astype(_BF16))  # (3*W*Cout, WCo)

    ops = [xl_rows, xb_rows, ryn_stack, sh_stack, sel, selt]
    for i, blk in enumerate(blocks):
        ops += [w_stacks[i], blk["gamma"], blk["beta"]]

    kernel = _make_decoder_kernel(depth, float(N * H * W))
    y = pl.pallas_call(
        kernel,
        out_shape=jax.ShapeDtypeStruct((NH, WCo), jnp.float32),
    )(*ops)

    # lane-dense (N*H, W*Cout) -> NCHW output (matches the PyTorch module)
    return jnp.transpose(y.reshape(N, H, W, Cout), (0, 3, 1, 2))


if __name__ == "__main__":
    key = jax.random.PRNGKey(0)
    k_big, k_low, k_par = jax.random.split(key, 3)

    # small shapes: skip-connection map and low-res map (W * Cout = 128 lanes)
    N, C_big, H, W = 2, 4, 16, 16
    C_low, h, w = 4, 8, 8
    input_channels = C_big + C_low        # channels after concat
    output_channels = 8
    depth = 2

    x_big = jax.random.normal(k_big, (N, C_big, H, W), jnp.float32)
    x_low = jax.random.normal(k_low, (N, C_low, h, w), jnp.float32)
    blocks = init_decoder_params(k_par, input_channels, output_channels, depth)

    out = jax.jit(decoder_forward)(x_big, x_low, blocks)
    out = jax.block_until_ready(out)
    assert out.shape == (N, output_channels, H, W), out.shape
    assert bool(jnp.all(jnp.isfinite(out)))
    print("KERNEL_OK")
</pallas_src>

<mosaic_0001>
module attributes {stable_mosaic.version = 11 : i64} {
  func.func @kernel(%arg0: memref<16x32xf32, #tpu.memory_space<vmem>>, %arg1: memref<32x64xf32, #tpu.memory_space<vmem>>, %arg2: memref<3x32x16xbf16, #tpu.memory_space<vmem>>, %arg3: memref<2x32x32xbf16, #tpu.memory_space<vmem>>, %arg4: memref<128x8xf32, #tpu.memory_space<vmem>>, %arg5: memref<8x128xf32, #tpu.memory_space<vmem>>, %arg6: memref<288x128xbf16, #tpu.memory_space<vmem>>, %arg7: memref<1x8xf32, #tpu.memory_space<vmem>>, %arg8: memref<1x8xf32, #tpu.memory_space<vmem>>, %arg9: memref<384x128xbf16, #tpu.memory_space<vmem>>, %arg10: memref<1x8xf32, #tpu.memory_space<vmem>>, %arg11: memref<1x8xf32, #tpu.memory_space<vmem>>, %arg12: memref<32x128xf32, #tpu.memory_space<vmem>>) attributes {dimension_semantics = [], scalar_prefetch = 0 : i64, scratch_operands = 0 : i64, tpu.core_type = #tpu.core_type<tc>} {
    %c0 = arith.constant 0 : index
    %c0_0 = arith.constant 0 : index
    %0 = vector.load %arg0[%c0, %c0_0] : memref<16x32xf32, #tpu.memory_space<vmem>>, vector<16x32xf32>
    %1 = arith.truncf %0 : vector<16x32xf32> to vector<16x32xbf16>
    %c0_1 = arith.constant 0 : index
    %c0_2 = arith.constant 0 : index
    %2 = vector.load %arg1[%c0_1, %c0_2] : memref<32x64xf32, #tpu.memory_space<vmem>>, vector<32x64xf32>
    %3 = arith.truncf %2 : vector<32x64xf32> to vector<32x64xbf16>
    %c0_3 = arith.constant 0 : index
    %c0_4 = arith.constant 0 : index
    %c0_5 = arith.constant 0 : index
    %4 = vector.load %arg2[%c0_3, %c0_4, %c0_5] : memref<3x32x16xbf16, #tpu.memory_space<vmem>>, vector<1x32x16xbf16>
    %5 = vector.shape_cast %4 : vector<1x32x16xbf16> to vector<32x16xbf16>
    %cst = arith.constant dense<0.000000e+00> : vector<32x32xf32>
    %6 = tpu.matmul %5, %1, %cst {dimension_numbers = #tpu.dot_dimension_numbers<[1], [0], [0], [1], [0, 0, 1, 1], [], []>} : vector<32x16xbf16>, vector<16x32xbf16>, vector<32x32xf32> -> vector<32x32xf32>
    %7 = arith.truncf %6 : vector<32x32xf32> to vector<32x32xbf16>
    %c1 = arith.constant 1 : index
    %c0_6 = arith.constant 0 : index
    %c0_7 = arith.constant 0 : index
    %8 = vector.load %arg2[%c1, %c0_6, %c0_7] : memref<3x32x16xbf16, #tpu.memory_space<vmem>>, vector<1x32x16xbf16>
    %9 = vector.shape_cast %8 : vector<1x32x16xbf16> to vector<32x16xbf16>
    %cst_8 = arith.constant dense<0.000000e+00> : vector<32x32xf32>
    %10 = tpu.matmul %9, %1, %cst_8 {dimension_numbers = #tpu.dot_dimension_numbers<[1], [0], [0], [1], [0, 0, 1, 1], [], []>} : vector<32x16xbf16>, vector<16x32xbf16>, vector<32x32xf32> -> vector<32x32xf32>
    %11 = arith.truncf %10 : vector<32x32xf32> to vector<32x32xbf16>
    %c2 = arith.constant 2 : index
    %c0_9 = arith.constant 0 : index
    %c0_10 = arith.constant 0 : index
    %12 = vector.load %arg2[%c2, %c0_9, %c0_10] : memref<3x32x16xbf16, #tpu.memory_space<vmem>>, vector<1x32x16xbf16>
    %13 = vector.shape_cast %12 : vector<1x32x16xbf16> to vector<32x16xbf16>
    %cst_11 = arith.constant dense<0.000000e+00> : vector<32x32xf32>
    %14 = tpu.matmul %13, %1, %cst_11 {dimension_numbers = #tpu.dot_dimension_numbers<[1], [0], [0], [1], [0, 0, 1, 1], [], []>} : vector<32x16xbf16>, vector<16x32xbf16>, vector<32x32xf32> -> vector<32x32xf32>
    %15 = arith.truncf %14 : vector<32x32xf32> to vector<32x32xbf16>
    %c0_12 = arith.constant 0 : index
    %c0_13 = arith.constant 0 : index
    %c0_14 = arith.constant 0 : index
    %16 = vector.load %arg3[%c0_12, %c0_13, %c0_14] : memref<2x32x32xbf16, #tpu.memory_space<vmem>>, vector<1x32x32xbf16>
    %17 = vector.shape_cast %16 : vector<1x32x32xbf16> to vector<32x32xbf16>
    %cst_15 = arith.constant dense<0.000000e+00> : vector<32x64xf32>
    %18 = tpu.matmul %17, %3, %cst_15 {dimension_numbers = #tpu.dot_dimension_numbers<[1], [0], [0], [1], [0, 0, 1, 1], [], []>} : vector<32x32xbf16>, vector<32x64xbf16>, vector<32x64xf32> -> vector<32x64xf32>
    %19 = arith.truncf %18 : vector<32x64xf32> to vector<32x64xbf16>
    %c1_16 = arith.constant 1 : index
    %c0_17 = arith.constant 0 : index
    %c0_18 = arith.constant 0 : index
    %20 = vector.load %arg3[%c1_16, %c0_17, %c0_18] : memref<2x32x32xbf16, #tpu.memory_space<vmem>>, vector<1x32x32xbf16>
    %21 = vector.shape_cast %20 : vector<1x32x32xbf16> to vector<32x32xbf16>
    %cst_19 = arith.constant dense<0.000000e+00> : vector<32x64xf32>
    %22 = tpu.matmul %21, %3, %cst_19 {dimension_numbers = #tpu.dot_dimension_numbers<[1], [0], [0], [1], [0, 0, 1, 1], [], []>} : vector<32x32xbf16>, vector<32x64xbf16>, vector<32x64xf32> -> vector<32x64xf32>
    %23 = arith.truncf %22 : vector<32x64xf32> to vector<32x64xbf16>
    %24 = tpu.concatenate %7, %11, %15, %19, %3, %23 in 1 : vector<32x32xbf16>, vector<32x32xbf16>, vector<32x32xbf16>, vector<32x64xbf16>, vector<32x64xbf16>, vector<32x64xbf16> -> vector<32x288xbf16>
    %c0_20 = arith.constant 0 : index
    %c0_21 = arith.constant 0 : index
    %25 = vector.load %arg6[%c0_20, %c0_21] : memref<288x128xbf16, #tpu.memory_space<vmem>>, vector<288x128xbf16>
    %cst_22 = arith.constant dense<0.000000e+00> : vector<32x128xf32>
    %26 = tpu.matmul %24, %25, %cst_22 {dimension_numbers = #tpu.dot_dimension_numbers<[1], [0], [0], [1], [0, 0, 1, 1], [], []>} : vector<32x288xbf16>, vector<288x128xbf16>, vector<32x128xf32> -> vector<32x128xf32>
    %cst_23 = arith.constant dense<0.000000e+00> : vector<128xf32>
    %27 = vector.multi_reduction <add>, %26, %cst_23 [0] : vector<32x128xf32> to vector<128xf32>
    %28 = vector.shape_cast %27 : vector<128xf32> to vector<1x128xf32>
    %29 = arith.mulf %26, %26 : vector<32x128xf32>
    %cst_24 = arith.constant dense<0.000000e+00> : vector<128xf32>
    %30 = vector.multi_reduction <add>, %29, %cst_24 [0] : vector<32x128xf32> to vector<128xf32>
    %31 = vector.shape_cast %30 : vector<128xf32> to vector<1x128xf32>
    %32 = tpu.concatenate %28, %31 in 0 : vector<1x128xf32>, vector<1x128xf32> -> vector<2x128xf32>
    %c0_25 = arith.constant 0 : index
    %c0_26 = arith.constant 0 : index
    %33 = vector.load %arg4[%c0_25, %c0_26] : memref<128x8xf32, #tpu.memory_space<vmem>>, vector<128x8xf32>
    %cst_27 = arith.constant dense<0.000000e+00> : vector<2x8xf32>
    %34 = tpu.matmul %32, %33, %cst_27 {dimension_numbers = #tpu.dot_dimension_numbers<[1], [0], [0], [1], [0, 0, 1, 1], [], []>} : vector<2x128xf32>, vector<128x8xf32>, vector<2x8xf32> -> vector<2x8xf32>
    %cst_28 = arith.constant 0.001953125 : f32
    %35 = vector.broadcast %cst_28 : f32 to vector<2x8xf32>
    %36 = arith.mulf %34, %35 : vector<2x8xf32>
    %37 = vector.extract_strided_slice %36 {offsets = [0, 0], sizes = [1, 8], strides = [1, 1]} : vector<2x8xf32> to vector<1x8xf32>
    %38 = vector.extract_strided_slice %36 {offsets = [1, 0], sizes = [1, 8], strides = [1, 1]} : vector<2x8xf32> to vector<1x8xf32>
    %39 = arith.mulf %37, %37 : vector<1x8xf32>
    %40 = arith.subf %38, %39 : vector<1x8xf32>
    %cst_29 = arith.constant 0.000000e+00 : f32
    %41 = vector.broadcast %cst_29 : f32 to vector<1x8xf32>
    %42 = arith.maximumf %40, %41 : vector<1x8xf32>
    %c0_30 = arith.constant 0 : index
    %c0_31 = arith.constant 0 : index
    %43 = vector.load %arg7[%c0_30, %c0_31] : memref<1x8xf32, #tpu.memory_space<vmem>>, vector<1x8xf32>
    %cst_32 = arith.constant 9.99999974E-6 : f32
    %44 = vector.broadcast %cst_32 : f32 to vector<1x8xf32>
    %45 = arith.addf %42, %44 : vector<1x8xf32>
    %46 = math.rsqrt %45 : vector<1x8xf32>
    %47 = arith.mulf %43, %46 : vector<1x8xf32>
    %c0_33 = arith.constant 0 : index
    %c0_34 = arith.constant 0 : index
    %48 = vector.load %arg8[%c0_33, %c0_34] : memref<1x8xf32, #tpu.memory_space<vmem>>, vector<1x8xf32>
    %49 = arith.mulf %37, %47 : vector<1x8xf32>
    %50 = arith.subf %48, %49 : vector<1x8xf32>
    %51 = tpu.concatenate %47, %50 in 0 : vector<1x8xf32>, vector<1x8xf32> -> vector<2x8xf32>
    %c0_35 = arith.constant 0 : index
    %c0_36 = arith.constant 0 : index
    %52 = vector.load %arg5[%c0_35, %c0_36] : memref<8x128xf32, #tpu.memory_space<vmem>>, vector<8x128xf32>
    %cst_37 = arith.constant dense<0.000000e+00> : vector<2x128xf32>
    %53 = tpu.matmul %51, %52, %cst_37 {dimension_numbers = #tpu.dot_dimension_numbers<[1], [0], [0], [1], [0, 0, 1, 1], [], []>} : vector<2x8xf32>, vector<8x128xf32>, vector<2x128xf32> -> vector<2x128xf32>
    %54 = vector.extract_strided_slice %53 {offsets = [0, 0], sizes = [1, 128], strides = [1, 1]} : vector<2x128xf32> to vector<1x128xf32>
    %55 = vector.broadcast %54 : vector<1x128xf32> to vector<32x128xf32>
    %56 = arith.mulf %26, %55 : vector<32x128xf32>
    %57 = vector.extract_strided_slice %53 {offsets = [1, 0], sizes = [1, 128], strides = [1, 1]} : vector<2x128xf32> to vector<1x128xf32>
    %58 = vector.broadcast %57 : vector<1x128xf32> to vector<32x128xf32>
    %59 = arith.addf %56, %58 : vector<32x128xf32>
    %cst_38 = arith.constant 0.000000e+00 : f32
    %60 = vector.broadcast %cst_38 : f32 to vector<32x128xf32>
    %61 = arith.maximumf %59, %60 : vector<32x128xf32>
    %62 = arith.truncf %61 : vector<32x128xf32> to vector<32x128xbf16>
    %c0_39 = arith.constant 0 : index
    %c0_40 = arith.constant 0 : index
    %c0_41 = arith.constant 0 : index
    %63 = vector.load %arg3[%c0_39, %c0_40, %c0_41] : memref<2x32x32xbf16, #tpu.memory_space<vmem>>, vector<1x32x32xbf16>
    %64 = vector.shape_cast %63 : vector<1x32x32xbf16> to vector<32x32xbf16>
    %cst_42 = arith.constant dense<0.000000e+00> : vector<32x128xf32>
    %65 = tpu.matmul %64, %62, %cst_42 {dimension_numbers = #tpu.dot_dimension_numbers<[1], [0], [0], [1], [0, 0, 1, 1], [], []>} : vector<32x32xbf16>, vector<32x128xbf16>, vector<32x128xf32> -> vector<32x128xf32>
    %66 = arith.truncf %65 : vector<32x128xf32> to vector<32x128xbf16>
    %c1_43 = arith.constant 1 : index
    %c0_44 = arith.constant 0 : index
    %c0_45 = arith.constant 0 : index
    %67 = vector.load %arg3[%c1_43, %c0_44, %c0_45] : memref<2x32x32xbf16, #tpu.memory_space<vmem>>, vector<1x32x32xbf16>
    %68 = vector.shape_cast %67 : vector<1x32x32xbf16> to vector<32x32xbf16>
    %cst_46 = arith.constant dense<0.000000e+00> : vector<32x128xf32>
    %69 = tpu.matmul %68, %62, %cst_46 {dimension_numbers = #tpu.dot_dimension_numbers<[1], [0], [0], [1], [0, 0, 1, 1], [], []>} : vector<32x32xbf16>, vector<32x128xbf16>, vector<32x128xf32> -> vector<32x128xf32>
    %70 = arith.truncf %69 : vector<32x128xf32> to vector<32x128xbf16>
    %71 = tpu.concatenate %66, %62, %70 in 1 : vector<32x128xbf16>, vector<32x128xbf16>, vector<32x128xbf16> -> vector<32x384xbf16>
    %c0_47 = arith.constant 0 : index
    %c0_48 = arith.constant 0 : index
    %72 = vector.load %arg9[%c0_47, %c0_48] : memref<384x128xbf16, #tpu.memory_space<vmem>>, vector<384x128xbf16>
    %cst_49 = arith.constant dense<0.000000e+00> : vector<32x128xf32>
    %73 = tpu.matmul %71, %72, %cst_49 {dimension_numbers = #tpu.dot_dimension_numbers<[1], [0], [0], [1], [0, 0, 1, 1], [], []>} : vector<32x384xbf16>, vector<384x128xbf16>, vector<32x128xf32> -> vector<32x128xf32>
    %cst_50 = arith.constant dense<0.000000e+00> : vector<128xf32>
    %74 = vector.multi_reduction <add>, %73, %cst_50 [0] : vector<32x128xf32> to vector<128xf32>
    %75 = vector.shape_cast %74 : vector<128xf32> to vector<1x128xf32>
    %76 = arith.mulf %73, %73 : vector<32x128xf32>
    %cst_51 = arith.constant dense<0.000000e+00> : vector<128xf32>
    %77 = vector.multi_reduction <add>, %76, %cst_51 [0] : vector<32x128xf32> to vector<128xf32>
    %78 = vector.shape_cast %77 : vector<128xf32> to vector<1x128xf32>
    %79 = tpu.concatenate %75, %78 in 0 : vector<1x128xf32>, vector<1x128xf32> -> vector<2x128xf32>
    %c0_52 = arith.constant 0 : index
    %c0_53 = arith.constant 0 : index
    %80 = vector.load %arg4[%c0_52, %c0_53] : memref<128x8xf32, #tpu.memory_space<vmem>>, vector<128x8xf32>
    %cst_54 = arith.constant dense<0.000000e+00> : vector<2x8xf32>
    %81 = tpu.matmul %79, %80, %cst_54 {dimension_numbers = #tpu.dot_dimension_numbers<[1], [0], [0], [1], [0, 0, 1, 1], [], []>} : vector<2x128xf32>, vector<128x8xf32>, vector<2x8xf32> -> vector<2x8xf32>
    %cst_55 = arith.constant 0.001953125 : f32
    %82 = vector.broadcast %cst_55 : f32 to vector<2x8xf32>
    %83 = arith.mulf %81, %82 : vector<2x8xf32>
    %84 = vector.extract_strided_slice %83 {offsets = [0, 0], sizes = [1, 8], strides = [1, 1]} : vector<2x8xf32> to vector<1x8xf32>
    %85 = vector.extract_strided_slice %83 {offsets = [1, 0], sizes = [1, 8], strides = [1, 1]} : vector<2x8xf32> to vector<1x8xf32>
    %86 = arith.mulf %84, %84 : vector<1x8xf32>
    %87 = arith.subf %85, %86 : vector<1x8xf32>
    %cst_56 = arith.constant 0.000000e+00 : f32
    %88 = vector.broadcast %cst_56 : f32 to vector<1x8xf32>
    %89 = arith.maximumf %87, %88 : vector<1x8xf32>
    %c0_57 = arith.constant 0 : index
    %c0_58 = arith.constant 0 : index
    %90 = vector.load %arg10[%c0_57, %c0_58] : memref<1x8xf32, #tpu.memory_space<vmem>>, vector<1x8xf32>
    %cst_59 = arith.constant 9.99999974E-6 : f32
    %91 = vector.broadcast %cst_59 : f32 to vector<1x8xf32>
    %92 = arith.addf %89, %91 : vector<1x8xf32>
    %93 = math.rsqrt %92 : vector<1x8xf32>
    %94 = arith.mulf %90, %93 : vector<1x8xf32>
    %c0_60 = arith.constant 0 : index
    %c0_61 = arith.constant 0 : index
    %95 = vector.load %arg11[%c0_60, %c0_61] : memref<1x8xf32, #tpu.memory_space<vmem>>, vector<1x8xf32>
    %96 = arith.mulf %84, %94 : vector<1x8xf32>
    %97 = arith.subf %95, %96 : vector<1x8xf32>
    %98 = tpu.concatenate %94, %97 in 0 : vector<1x8xf32>, vector<1x8xf32> -> vector<2x8xf32>
    %c0_62 = arith.constant 0 : index
    %c0_63 = arith.constant 0 : index
    %99 = vector.load %arg5[%c0_62, %c0_63] : memref<8x128xf32, #tpu.memory_space<vmem>>, vector<8x128xf32>
    %cst_64 = arith.constant dense<0.000000e+00> : vector<2x128xf32>
    %100 = tpu.matmul %98, %99, %cst_64 {dimension_numbers = #tpu.dot_dimension_numbers<[1], [0], [0], [1], [0, 0, 1, 1], [], []>} : vector<2x8xf32>, vector<8x128xf32>, vector<2x128xf32> -> vector<2x128xf32>
    %101 = vector.extract_strided_slice %100 {offsets = [0, 0], sizes = [1, 128], strides = [1, 1]} : vector<2x128xf32> to vector<1x128xf32>
    %102 = vector.broadcast %101 : vector<1x128xf32> to vector<32x128xf32>
    %103 = arith.mulf %73, %102 : vector<32x128xf32>
    %104 = vector.extract_strided_slice %100 {offsets = [1, 0], sizes = [1, 128], strides = [1, 1]} : vector<2x128xf32> to vector<1x128xf32>
    %105 = vector.broadcast %104 : vector<1x128xf32> to vector<32x128xf32>
    %106 = arith.addf %103, %105 : vector<32x128xf32>
    %cst_65 = arith.constant 0.000000e+00 : f32
    %107 = vector.broadcast %cst_65 : f32 to vector<32x128xf32>
    %108 = arith.maximumf %106, %107 : vector<32x128xf32>
    %c0_66 = arith.constant 0 : index
    %c0_67 = arith.constant 0 : index
    %109 = vector.load %arg12[%c0_66, %c0_67] : memref<32x128xf32, #tpu.memory_space<vmem>>, vector<32x128xf32>
    tpu.vector_store %arg12[%c0_66, %c0_67], %108 {strides = array<i32>} : memref<32x128xf32, #tpu.memory_space<vmem>>, vector<32x128xf32>,
    return
  }
}

</mosaic_0001>

<bundles_post_ra>
// kernel: decoder_forward.1
= control target key start
LH: loop header
LB: loop body
LE: loop exit
PB: predicated region body
PF: predicated region fallthrough
CT: control target
= control target key end

     0   :  { %vm67_vm0 = vcmask 130048   ;;  %vm211_vm1 = vcmask 261120   ;;  %s1480_s14 = smov 96   ;;  %vm366_vm2 = vcmask 785408   ;;  %vm361_vm3 = vcmask 523264   ;;  %s2020_s0 = inlined_call_operand.vmem [shape: f32[16,32], index: 0, kind: input, shape index: {}]   ;;  %s2021_s2 = inlined_call_operand.vmem [shape: bf16[3,32,16], index: 2, kind: input, shape index: {}]   ;;  %s2022_s1 = inlined_call_operand.vmem [shape: f32[32,64], index: 1, kind: input, shape index: {}]   ;;  %s2023_s3 = inlined_call_operand.vmem [shape: bf16[2,32,32], index: 3, kind: input, shape index: {}]   ;;  %s2024_s6 = inlined_call_operand.vmem [shape: bf16[288,128], index: 6, kind: input, shape index: {}]   ;;  %s2025_s4 = inlined_call_operand.vmem [shape: f32[128,8], index: 4, kind: input, shape index: {}]   ;;  %s2026_s5 = inlined_call_operand.vmem [shape: f32[8,128], index: 5, kind: input, shape index: {}]   ;;  %s2027_s9 = inlined_call_operand.vmem [shape: bf16[384,128], index: 9, kind: input, shape index: {}]   ;;  %s2028_s7 = inlined_call_operand.vmem [shape: f32[1,8], index: 7, kind: input, shape index: {}]   ;;  %s2029_s8 = inlined_call_operand.vmem [shape: f32[1,8], index: 8, kind: input, shape index: {}]   ;;  %s2030_s10 = inlined_call_operand.vmem [shape: f32[1,8], index: 10, kind: input, shape index: {}]   ;;  %s2031_s11 = inlined_call_operand.vmem [shape: f32[1,8], index: 11, kind: input, shape index: {}]   ;;  %s2032_s12 = inlined_call_operand.vmem [shape: f32[32,128], index: 12, kind: output, shape index: {}]  }
   0x1   :  { %v42_v0 = vld [vmem:[%s2020_s0] sm:$0xff]  ;;  %v43_v1 = vld [vmem:[%s2020_s0 + $0x8] sm:$0xff]  ;;  %v47_v3 = vld [vmem:[%s2022_s1 + $0x10] sm:$0xff]  ;;  %s1481_s0 = smov 32   ;;  %vm610_vm4 = vcmask 1040384   ;;  %vm681_vm8 = vcmask 64512  }
   0x2   :  { %v44_v2 = vpack.c.bf16 %v43_v1, %v42_v0  ;;  %v48_v4 = vld [vmem:[%s2022_s1 + $0x18] sm:$0xff]  ;;  %v45_v5 = vld [vmem:[%s2022_s1] sm:$0xff]  ;;  %v51_v7 = vpack.c.bf16 %v47_v3, %v47_v3  ;;  %v46_v9 = vld [vmem:[%s2022_s1 + $0x8] sm:$0xff] }
   0x3   :  { %v1412_v6 = vld [vmem:[%s2021_s2] sm:$0xff]  ;;  %v52_v8 = vpack.c.bf16 %v48_v4, %v48_v4  ;;  %v49_v10 = vpack.c.bf16 %v45_v5, %v45_v5  ;;  %v50_v11 = vpack.c.bf16 %v46_v9, %v46_v9  ;;  %v1414_v13 = vld [vmem:[%s2021_s2 + $0x10] sm:$0xff]  ;;  %v1413_v21 = vld [vmem:[%s2021_s2 + $0x8] sm:$0xff] }
   0x4   :  { %81 = vmatpush.bf16.msra.mxu0 %v44_v2  ;;  %169 = vmatpush.bf16.msra.mxu2 %v44_v2  ;;  %v1416_v12 = vld [vmem:[%s2021_s2 + $0x20] sm:$0xff]  ;;  %v205_v14 = vunpack.c.l.b16 %v51_v7  ;;  %v1417_v22 = vld [vmem:[%s2021_s2 + $0x28] sm:$0xff]  ;;  %v1415_v23 = vld [vmem:[%s2021_s2 + $0x18] sm:$0xff] }
   0x5   :  { %v206_v15 = vunpack.c.l.b16 %v52_v8  ;;  %v203_v16 = vunpack.c.l.b16 %v49_v10  ;;  %125 = vmatpush.bf16.msra.mxu1 %v44_v2  ;;  %v204_v17 = vunpack.c.l.b16 %v50_v11  ;;  %v1584_v20 = vld [vmem:[%s2023_s3] sm:$0xff]  ;;  %v1603_v24 = vld [vmem:[%s2023_s3 + $0x8] sm:$0xff]  ;;  %v1610_v25 = vld [vmem:[%s2023_s3 + $0x10] sm:$0xff] }
   0x6   :  { %v1617_v26 = vld [vmem:[%s2023_s3 + $0x18] sm:$0xff]  ;;  %s1479_s3 = smov 64  }
   0x7   :  { %1182 = vmatmul.msk.bf16.vlgmr.msra.gmra.mxu0 %vm67_vm0, %v1412_v6  ;;  %v1575_v18 = vpack.c.b16 %v206_v15, %v205_v14  ;;  %1210 = vmatmul.msk.bf16.vlgmr.msra.gmra.mxu2 %vm67_vm0, %v1416_v12  ;;  %v207_v19 = vpack.c.b16 %v204_v17, %v203_v16 }
   0x8   :  { %1196 = vmatmul.msk.bf16.vlgmr.msra.gmra.mxu1 %vm67_vm0, %v1414_v13 }
   0x9   :  { %224 = vmatpush.bf16.msra.mxu3 %v1575_v18  ;;  %268 = vmatpush.bf16.msrb.mxu0 %v1575_v18 }
   0xd   :  { %225 = vmatpush.bf16.msra.mxu3 %v207_v19  ;;  %269 = vmatpush.bf16.msrb.mxu0 %v207_v19 }
  0x10   :  { %1220 = vmatmul.msk.bf16.vlgmr.msra.gmra.mxu3 %vm211_vm1, %v1584_v20 }
  0x17   :  { %1183 = vmatmul.msk.bf16.gmra.mxu0 %vm67_vm0, %v1413_v21  ;;  %1211 = vmatmul.msk.bf16.gmra.mxu2 %vm67_vm0, %v1417_v22 }
  0x18   :  { %1197 = vmatmul.msk.bf16.gmra.mxu1 %vm67_vm0, %v1415_v23 }
  0x20   :  { %1221 = vmatmul.msk.bf16.gmra.mxu3 %vm211_vm1, %v1603_v24 }
  0x27   :  { %1234 = vmatmul.msk.bf16.vlgmr.msrb.gmra.mxu0 %vm211_vm1, %v1610_v25 }
  0x37   :  { %1235 = vmatmul.msk.bf16.gmra.mxu0 %vm211_vm1, %v1617_v26 }
  0x84   :  { %v83_v27 = vpop.f32.mrf.mxu0 }
  0x85   :  { %v93_v29 = vpack.c.bf16 %v83_v27, %v83_v27  ;;  %v1621_v31 = vpop.f32.mrf.mxu1 }
  0x86   :  { %v137_v14 = vpack.c.bf16 %v1621_v31, %v1621_v31 }
  0x87   :  { %v1623_v33 = vunpack.c.l.b16 %v93_v29 }
  0x88   :  { %v299_v27 = vunpack.c.l.b16 %v137_v14  ;;  %v1721_v14 = vld [vmem:[%s2025_s4 + $0x78] sm:$0xff] }
  0x8a   :  { %v171_v28 = vpop.f32.mrf.mxu2 }
  0x8b   :  { %v181_v35 = vpack.c.bf16 %v171_v28, %v171_v28 }
  0x8c   :  { %v85_v30 = vpop.f32.mrf.mxu0 }
  0x8d   :  { %v94_v32 = vpack.c.bf16 %v85_v30, %v85_v30  ;;  %v313_v39 = vunpack.c.l.b16 %v181_v35  ;;  %v129_v43 = vpop.f32.mrf.mxu1 }
  0x8e   :  { %v138_v15 = vpack.c.bf16 %v129_v43, %v129_v43  ;;  %v1435_v43 = vld [vmem:[%s2024_s6 + $0x68] sm:$0xff] }
  0x8f   :  { %v1625_v34 = vunpack.c.l.b16 %v94_v32 }
  0x90   :  { %v300_v28 = vunpack.c.l.b16 %v138_v15  ;;  %v1727_v15 = vld [vmem:[%s2025_s4 + $0x70] sm:$0xff] }
  0x91   :  { %v293_v36 = vpack.c.b16 %v1625_v34, %v1623_v33 }
  0x92   :  { %v173_v37 = vpop.f32.mrf.mxu2  ;;  %v303_v32 = vpack.c.b16 %v300_v28, %v299_v27  ;;  %v1775_v28 = vld [vmem:[%s2025_s4 + $0x30] sm:$0xff] }
  0x93   :  { %v227_v38 = vpop.f32.mrf.mxu3  ;;  %v182_v40 = vpack.c.bf16 %v173_v37, %v173_v37 }
  0x94   :  { %v88_v41 = vpop.f32.mrf.mxu0  ;;  %v237_v45 = vpack.c.bf16 %v227_v38, %v227_v38 }
  0x95   :  { %v314_v42 = vunpack.c.l.b16 %v182_v40  ;;  %v95_v46 = vpack.c.bf16 %v88_v41, %v88_v41  ;;  %v132_v56 = vpop.f32.mrf.mxu1  ;;  %v1437_v40 = vld [vmem:[%s2024_s6 + $0x78] sm:$0xff]  ;;  %v1436_v41 = vld [vmem:[%s2024_s6 + $0x70] sm:$0xff] }
  0x96   :  { %v327_v48 = vunpack.c.l.b16 %v237_v45  ;;  %v139_v5 = vpack.c.bf16 %v132_v56, %v132_v56  ;;  %550 = vmatpush.bf16.msrb.mxu2 %v1437_v40  ;;  %v1428_v45 = vld [vmem:[%s2024_s6 + $0x30] sm:$0xff]  ;;  %v1430_v56 = vld [vmem:[%s2024_s6 + $0x40] sm:$0xff] }
  0x97   :  { %v317_v44 = vpack.c.b16 %v314_v42, %v313_v39  ;;  %v1630_v53 = vunpack.c.l.b16 %v95_v46  ;;  %v1429_v42 = vld [vmem:[%s2024_s6 + $0x38] sm:$0xff] }
  0x98   :  { %v301_v17 = vunpack.c.l.b16 %v139_v5  ;;  %531 = vmatpush.bf16.msrb.mxu1 %v1429_v42  ;;  %v1433_v46 = vld [vmem:[%s2024_s6 + $0x58] sm:$0xff] }
  0x99   :  { %319 = vrot.lane.b32.xlu2 %v317_v44, %s1479_s3  ;;  %v1434_v44 = vld [vmem:[%s2024_s6 + $0x60] sm:$0xff] }
  0x9a   :  { %v176_v58 = vpop.f32.mrf.mxu2  ;;  %551 = vmatpush.bf16.msrb.mxu2 %v1436_v41 }
  0x9b   :  { %v229_v47 = vpop.f32.mrf.mxu3  ;;  %v183_v7 = vpack.c.bf16 %v176_v58, %v176_v58  ;;  %v1424_v58 = vld [vmem:[%s2024_s6 + $0x10] sm:$0xff] }
  0x9c   :  { %v238_v49 = vpack.c.bf16 %v229_v47, %v229_v47  ;;  %v90_v50 = vpop.f32.mrf.mxu0  ;;  %532 = vmatpush.bf16.msrb.mxu1 %v1428_v45  ;;  %v1427_v47 = vld [vmem:[%s2024_s6 + $0x28] sm:$0xff] }
  0x9d   :  { %v96_v51 = vpack.c.bf16 %v90_v50, %v90_v50  ;;  %v134_v62 = vpop.f32.mrf.mxu1  ;;  %v1439_v50 = vld [vmem:[%s2024_s6 + $0x88] sm:$0xff] }
  0x9e   :  { %v328_v52 = vunpack.c.l.b16 %v238_v49  ;;  %v140_v9 = vpack.c.bf16 %v134_v62, %v134_v62  ;;  %552 = vmatpush.bf16.msrb.mxu2 %v1435_v43  ;;  %v1426_v49 = vld [vmem:[%s2024_s6 + $0x20] sm:$0xff]  ;;  %575 = vmatpush.bf16.msrb.mxu3 %v1439_v50 }
  0x9f   :  { %v1632_v54 = vunpack.c.l.b16 %v96_v51  ;;  %v1431_v51 = vld [vmem:[%s2024_s6 + $0x48] sm:$0xff] }
  0xa0   :  { %v331_v55 = vpack.c.b16 %v328_v52, %v327_v48  ;;  %v302_v21 = vunpack.c.l.b16 %v140_v9  ;;  %533 = vmatpush.bf16.msrb.mxu1 %v1427_v47  ;;  %v1432_v48 = vld [vmem:[%s2024_s6 + $0x50] sm:$0xff]  ;;  %v1425_v52 = vld [vmem:[%s2024_s6 + $0x18] sm:$0xff] }
  0xa1   :  { %v294_v57 = vpack.c.b16 %v1632_v54, %v1630_v53  ;;  %v1733_v53 = vld [vmem:[%s2025_s4 + $0x68] sm:$0xff]  ;;  %v1739_v54 = vld [vmem:[%s2025_s4 + $0x60] sm:$0xff] }
  0xa2   :  { %333 = vrot.lane.b32.xlu0 %v331_v55, %s1480_s14  ;;  %v178_v1 = vpop.f32.mrf.mxu2  ;;  %v304_v29 = vpack.c.b16 %v302_v21, %v301_v17  ;;  %553 = vmatpush.bf16.msrb.mxu2 %v1434_v44  ;;  %v1438_v55 = vld [vmem:[%s2024_s6 + $0x80] sm:$0xff]  ;;  %v1757_v17 = vld [vmem:[%s2025_s4 + $0x48] sm:$0xff] }
  0xa3   :  { %v232_v59 = vpop.f32.mrf.mxu3  ;;  %v184_v10 = vpack.c.bf16 %v178_v1, %v178_v1  ;;  %576 = vmatpush.bf16.msrb.mxu3 %v1438_v55 }
  0xa4   :  { %v271_v60 = vpop.f32.mrf.mxu0  ;;  %v239_v61 = vpack.c.bf16 %v232_v59, %v232_v59  ;;  %534 = vmatpush.bf16.msrb.mxu1 %v1426_v49  ;;  %v1423_v59 = vld [vmem:[%s2024_s6 + $0x8] sm:$0xff] }
  0xa5   :  { %v281_v63 = vpack.c.bf16 %v271_v60, %v271_v60  ;;  %v316_v22 = vunpack.c.l.b16 %v184_v10  ;;  %v1422_v60 = vld [vmem:[%s2024_s6] sm:$0xff] }
  0xa6   :  { %v329_v2 = vunpack.c.l.b16 %v239_v61  ;;  %554 = vmatpush.bf16.msrb.mxu2 %v1433_v46 }
  0xa7   :  { %v345_v11 = vunpack.c.l.b16 %v281_v63  ;;  %628 = vmatpush.msra.mxu3 %v1721_v14 }
  0xa8   :  { %535 = vmatpush.bf16.msrb.mxu1 %v1425_v52 }
  0xa9   :  { %629 = vmatpush.msra.mxu3 %v1727_v15 }
  0xaa   :  { %337 = vrot.lane.b32.xlu0 %v207_v19, %s1481_s0  ;;  %v315_v19 = vunpack.c.l.b16 %v183_v7  ;;  %555 = vmatpush.bf16.msrb.mxu2 %v1432_v48 }
  0xab   :  { %v234_v0 = vpop.f32.mrf.mxu3  ;;  %630 = vmatpush.msra.mxu3 %v1733_v53 }
  0xac   :  { %v240_v3 = vpack.c.bf16 %v234_v0, %v234_v0  ;;  %v273_v4 = vpop.f32.mrf.mxu0  ;;  %v318_v30 = vpack.c.b16 %v316_v22, %v315_v19  ;;  %536 = vmatpush.bf16.msrb.mxu1 %v1424_v58  ;;  %v1763_v22 = vld [vmem:[%s2025_s4 + $0x40] sm:$0xff] }
  0xad   :  { %v282_v6 = vpack.c.bf16 %v273_v4, %v273_v4  ;;  %631 = vmatpush.msra.mxu3 %v1739_v54 }
  0xae   :  { %v330_v8 = vunpack.c.l.b16 %v240_v3  ;;  %556 = vmatpush.bf16.msrb.mxu2 %v1431_v51 }
  0xaf   :  { %v346_v12 = vunpack.c.l.b16 %v282_v6 }
  0xb0   :  { %v332_v13 = vpack.c.b16 %v330_v8, %v329_v2  ;;  %537 = vmatpush.bf16.msrb.mxu1 %v1423_v59 }
  0xb1   :  { %v349_v16 = vpack.c.b16 %v346_v12, %v345_v11 }
  0xb2   :  { %339 = vrot.lane.b32.xlu0 %v1575_v18, %s1481_s0  ;;  %335 = vrot.lane.b32.xlu2 %v332_v13, %s1480_s14 }
  0xb3   :  { %351 = vrot.lane.b32.xlu1 %v349_v16, %s1480_s14  ;;  %557 = vmatpush.bf16.msrb.mxu2 %v1430_v56  ;;  %v1751_v16 = vld [vmem:[%s2025_s4 + $0x50] sm:$0xff] }
  0xb4   :  { %v276_v23 = vpop.f32.mrf.mxu0  ;;  %538 = vmatpush.bf16.msrb.mxu1 %v1422_v60 }
  0xb5   :  { %v283_v31 = vpack.c.bf16 %v276_v23, %v276_v23  ;;  %v1769_v23 = vld [vmem:[%s2025_s4 + $0x38] sm:$0xff] }
  0xb7   :  { %v347_v37 = vunpack.c.l.b16 %v283_v31  ;;  %v1792_v31 = vld [vmem:[%s2025_s4 + $0x18] sm:$0xff] }
  0xba   :  { %321 = vrot.lane.b32.xlu0 %v318_v30, %s1479_s3  ;;  %307 = vrot.lane.b32.xlu2 %v304_v29, %s1481_s0  ;;  %v1781_v29 = vld [vmem:[%s2025_s4 + $0x28] sm:$0xff]  ;;  %v1786_v30 = vld [vmem:[%s2025_s4 + $0x20] sm:$0xff] }
  0xbb   :  { %305 = vrot.lane.b32.xlu1 %v303_v32, %s1481_s0 }
  0xbc   :  { %v278_v18 = vpop.f32.mrf.mxu0 }
  0xbd   :  { %v284_v35 = vpack.c.bf16 %v278_v18, %v278_v18 }
  0xbf   :  { %v348_v38 = vunpack.c.l.b16 %v284_v35  ;;  %v1798_v35 = vld [vmem:[%s2025_s4 + $0x10] sm:$0xff] }
  0xc1   :  { %v350_v39 = vpack.c.b16 %v348_v38, %v347_v37  ;;  %v1804_v38 = vld [vmem:[%s2025_s4 + $0x8] sm:$0xff] }
  0xc3   :  { %353 = vrot.lane.b32.xlu1 %v350_v39, %s1480_s14  ;;  %v1810_v39 = vld [vmem:[%s2025_s4] sm:$0xff] }
  0xf3   :  { %v320_v63 = vpop.permute.xlu2 %319 }
 0x10c   :  { %v336_v5 = vpop.permute.xlu2 %335 }
 0x114   :  { %v334_v61 = vpop.permute.xlu0 %333  ;;  %v308_v12 = vpop.permute.xlu2 %307 }
 0x115   :  { %v360_v33 = vsel %vm211_vm1, %v294_v57, %v308_v12  ;;  %v1745_v57 = vld [vmem:[%s2025_s4 + $0x58] sm:$0xff] }
 0x116   :  { %632 = vmatpush.msra.mxu3 %v1745_v57 }
 0x118   :  { %633 = vmatpush.msra.mxu3 %v1751_v16 }
 0x11a   :  { %634 = vmatpush.msra.mxu3 %v1757_v17 }
 0x11c   :  { %v338_v62 = vpop.permute.xlu0 %337  ;;  %635 = vmatpush.msra.mxu3 %v1763_v22 }
 0x11d   :  { %v374_v0 = vsel %vm211_vm1, %v334_v61, %v338_v62 }
 0x11e   :  { %636 = vmatpush.msra.mxu3 %v1769_v23 }
 0x120   :  { %637 = vmatpush.msra.mxu3 %v1775_v28 }
 0x122   :  { %638 = vmatpush.msra.mxu3 %v1781_v29 }
 0x124   :  { %v340_v7 = vpop.permute.xlu0 %339  ;;  %639 = vmatpush.msra.mxu3 %v1786_v30 }
 0x125   :  { %v352_v1 = vpop.permute.xlu1 %351  ;;  %v376_v9 = vsel %vm211_vm1, %v336_v5, %v340_v7 }
 0x126   :  { %1308 = vmatmul.msk.bf16.vlgmr.msrb.gmra.mxu3 %vm211_vm1, %v352_v1  ;;  %v378_v2 = vsel %vm366_vm2, %v374_v0, %v352_v1 }
 0x127   :  { %558 = vmatmul.bf16.vlgmr.msrb.gmra.mxu2 %v378_v2  ;;  %640 = vmatpush.msra.mxu3 %v1792_v31 }
 0x129   :  { %641 = vmatpush.msra.mxu3 %v1798_v35 }
 0x12b   :  { %642 = vmatpush.msra.mxu3 %v1804_v38 }
 0x12c   :  { %v322_v13 = vpop.permute.xlu0 %321 }
 0x12d   :  { %v306_v3 = vpop.permute.xlu1 %305  ;;  %v365_v34 = vsel %vm361_vm3, %v360_v33, %v322_v13  ;;  %643 = vmatpush.msra.mxu3 %v1810_v39 }
 0x12e   :  { %v357_v4 = vsel %vm211_vm1, %v293_v36, %v306_v3  ;;  %v371_v36 = vsel %vm366_vm2, %v365_v34, %v336_v5 }
 0x12f   :  { %v363_v6 = vsel %vm361_vm3, %v357_v4, %v320_v63 }
 0x130   :  { %v368_v8 = vsel %vm366_vm2, %v363_v6, %v334_v61 }
 0x131   :  { %539 = vmatmul.bf16.vlgmr.msrb.gmra.mxu1 %v368_v8 }
 0x135   :  { %v354_v10 = vpop.permute.xlu1 %353 }
 0x136   :  { %1309 = vmatmul.msk.bf16.gmra.mxu3 %vm211_vm1, %v354_v10  ;;  %v381_v11 = vsel %vm366_vm2, %v376_v9, %v354_v10 }
 0x137   :  { %563 = vmatmul.bf16.gmra.mxu2 %v381_v11 }
 0x141   :  { %544 = vmatmul.bf16.gmra.mxu1 %v371_v36 }
 0x1a9   :  { %v578_v19 = vpop.f32.mrf.mxu3 }
 0x1aa   :  { %v559_v21 = vpop.f32.mrf.mxu2 }
 0x1ae   :  { %v540_v27 = vpop.f32.mrf.mxu1 }
 0x1af   :  { %v560_v44 = vadd.f32 %v559_v21, %v540_v27 }
 0x1b1   :  { %v580_v18 = vpop.f32.mrf.mxu3  ;;  %v1816_v47 = vadd.f32 %v578_v19, %v560_v44 }
 0x1b2   :  { %v561_v32 = vpop.f32.mrf.mxu2 }
 0x1b3   :  { %v597_v52 = vmul.f32 %v1816_v47, %v1816_v47 }
 0x1b6   :  { %v542_v37 = vpop.f32.mrf.mxu1 }
 0x1b7   :  { %v562_v41 = vadd.f32 %v561_v32, %v542_v37 }
 0x1b9   :  { %v583_v42 = vpop.f32.mrf.mxu3  ;;  %v1814_v46 = vadd.f32 %v580_v18, %v562_v41  ;;  %v1844_v41 = vld [vmem:[%s2027_s9 + $0x78] sm:$0xff] }
 0x1ba   :  { %v564_v40 = vpop.f32.mrf.mxu2 }
 0x1bb   :  { %v598_v49 = vmul.f32 %v1814_v46, %v1814_v46  ;;  %v588_v55 = vadd.f32 %v1814_v46, %v1816_v47 }
 0x1bd   :  { %v601_v60 = vadd.f32 %v598_v49, %v597_v52  ;;  %v1856_v49 = vld [vmem:[%s2027_s9 + $0x68] sm:$0xff]  ;;  %v1862_v52 = vld [vmem:[%s2027_s9 + $0x60] sm:$0xff] }
 0x1be   :  { %v545_v43 = vpop.f32.mrf.mxu1 }
 0x1bf   :  { %v565_v45 = vadd.f32 %v564_v40, %v545_v43  ;;  %v1838_v40 = vld [vmem:[%s2026_s5] sm:$0xff] }
 0x1c0   :  { %700 = vmatpush.msra.mxu1 %v1838_v40 }
 0x1c1   :  { %v1818_v48 = vadd.f32 %v583_v42, %v565_v45  ;;  %v585_v59 = vpop.f32.mrf.mxu3  ;;  %v1850_v42 = vld [vmem:[%s2027_s9 + $0x70] sm:$0xff] }
 0x1c2   :  { %v566_v50 = vpop.f32.mrf.mxu2  ;;  %1464 = vmatpush.bf16.msrb.mxu1 %v1844_v41 }
 0x1c3   :  { %v599_v56 = vmul.f32 %v1818_v48, %v1818_v48  ;;  %v589_v61 = vadd.f32 %v588_v55, %v1818_v48 }
 0x1c5   :  { %v602_v63 = vadd.f32 %v601_v60, %v599_v56 }
 0x1c6   :  { %v547_v51 = vpop.f32.mrf.mxu1  ;;  %1465 = vmatpush.bf16.msrb.mxu1 %v1850_v42 }
 0x1c7   :  { %v567_v58 = vadd.f32 %v566_v50, %v547_v51 }
 0x1c9   :  { %v1829_v62 = vadd.f32 %v585_v59, %v567_v58  ;;  %v655_v58 = vld [vmem:[%s2028_s7] sm:$0x1] }
 0x1ca   :  { %1466 = vmatpush.bf16.msrb.mxu1 %v1856_v49 }
 0x1cb   :  { %v590_v0 = vadd.f32 %v589_v61, %v1829_v62  ;;  %v600_v1 = vmul.f32 %v1829_v62, %v1829_v62  ;;  %v673_v61 = vld [vmem:[%s2029_s8] sm:$0x1] }
 0x1cd   :  { %v591_v2 = vrot.slane %v590_v0, 4  ;;  %v603_v3 = vadd.f32 %v602_v63, %v600_v1 }
 0x1ce   :  { %1467 = vmatpush.bf16.msrb.mxu1 %v1862_v52 }
 0x1cf   :  { %v592_v4 = vadd.f32 %v591_v2, %v590_v0  ;;  %v604_v5 = vrot.slane %v603_v3, 4 }
 0x1d1   :  { %v593_v6 = vrot.slane %v592_v4, 2  ;;  %v605_v7 = vadd.f32 %v604_v5, %v603_v3  ;;  %v1876_v3 = vld [vmem:[%s2027_s9 + $0x58] sm:$0xff]  ;;  %v1888_v5 = vld [vmem:[%s2027_s9 + $0x48] sm:$0xff] }
 0x1d2   :  { %1468 = vmatpush.bf16.msrb.mxu1 %v1876_v3 }
 0x1d3   :  { %v594_v8 = vadd.f32 %v593_v6, %v592_v4  ;;  %v606_v9 = vrot.slane %v605_v7, 2  ;;  %v1882_v4 = vld [vmem:[%s2027_s9 + $0x50] sm:$0xff]  ;;  %v1894_v6 = vld [vmem:[%s2027_s9 + $0x40] sm:$0xff] }
 0x1d5   :  { %v595_v10 = vrot.slane %v594_v8, 1  ;;  %v607_v11 = vadd.f32 %v606_v9, %v605_v7 }
 0x1d6   :  { %1469 = vmatpush.bf16.msrb.mxu1 %v1882_v4 }
 0x1d7   :  { %v608_v12 = vrot.slane %v607_v11, 1  ;;  %v596_v13 = vadd.f32 %v595_v10, %v594_v8 }
 0x1d9   :  { %v609_v33 = vadd.f32 %v608_v12, %v607_v11 }
 0x1da   :  { %1470 = vmatpush.bf16.msrb.mxu1 %v1888_v5 }
 0x1db   :  { %v611_v34 = vsel %vm610_vm4, %v596_v13, %v609_v33 }
 0x1dc   :  { %644 = vmatmul.f32.vlgmr.msra.gmra.mxu3 %v611_v34 }
 0x1de   :  { %1471 = vmatpush.bf16.msrb.mxu1 %v1894_v6 }
 0x25f   :  { %v645_v36 = vpop.f32.mrf.mxu3 }
 0x260   :  { %v648_v19 = vmul.f32 0.001953125, %v645_v36 }
 0x262   :  { %v649_v21 = vmul.f32 %v648_v19, %v648_v19 }
 0x264   :  { %v651_v27 = vrot.slane %v649_v21, 7  ;;  %v1447_v21 = vld [vmem:[%s2027_s9 + $0x38] sm:$0xff] }
 0x265   :  { %997 = vmatpush.bf16.msra.mxu0 %v1447_v21 }
 0x266   :  { %v653_v32 = vsub.f32 %v648_v19, %v651_v27 }
 0x268   :  { %v654_v18 = vmax.f32 %v653_v32, 0.0 }
 0x26a   :  { %v656_v37 = vadd.f32 1e-05, %v654_v18 }
 0x26c   :  { %1475 = vrsqrt.f32 %v656_v37  ;;  %vm663_vm6 = vweird.f32 %v656_v37 }
 0x272   :  { %v1476_v43 = vpop.eup %1475 }
 0x273   :  { %v658_v44 = vmul.f32 %v1476_v43, %v656_v37  ;;  %vm664_vm5 = vweird.f32 %v1476_v43 }
 0x274   :  { %vm665_vm7 = vmor %vm663_vm6, %vm664_vm5 }
 0x275   :  { %v659_v45 = vmul.f32 %v1476_v43, %v658_v44 }
 0x277   :  { %v660_v50 = vmul.f32 0.5, %v659_v45 }
 0x279   :  { %v661_v51 = vsub.f32 1.5, %v660_v50 }
 0x27b   :  { %v662_v55 = vmul.f32 %v1476_v43, %v661_v51 }
 0x27d   :  { %v666_v56 = vsel %vm665_vm7, %v1476_v43, %v662_v55  ;;  %v1463_v55 = vld [vmem:[%s2027_s9 + $0xb8] sm:$0xff] }
 0x27e   :  { %668 = vst [vmem:[#allocation1] sm:$0xff] %v666_v56 }
 0x285   :  { %v670_v59 = vld [vmem:[#allocation1 + $0x1] ss:$9 sm:$0xff] }
 0x286   :  { %v672_v60 = vmul.f32 %v670_v59, %v655_v58 }
 0x288   :  { %v674_v63 = vmul.f32 %v672_v60, %v648_v19 }
 0x28a   :  { %v675_v0 = vsub.f32 %v673_v61, %v674_v63 }
 0x28c   :  { %v677_v1 = vperm.slane %v675_v0, 0 }
 0x28e   :  { %v679_v2 = vsel %vm610_vm4, %v672_v60, %v677_v1 }
 0x28f   :  { %1310 = vmatmul.msk.f32.vlgmr.msra.gmra.mxu1 %vm681_vm8, %v679_v2 }
 0x30c   :  { %v702_v7 = vpop.f32.mrf.mxu1 }
 0x30d   :  { %v705_v8 = vperm.slane %v702_v7, 0  ;;  %v710_v9 = vperm.slane %v702_v7, 1 }
 0x30f   :  { %v708_v10 = vmul.f32 %v705_v8, %v1818_v48  ;;  %v709_v11 = vmul.f32 %v705_v8, %v1829_v62  ;;  %v706_v12 = vmul.f32 %v705_v8, %v1816_v47  ;;  %v707_v13 = vmul.f32 %v705_v8, %v1814_v46 }
 0x311   :  { %v713_v33 = vadd.f32 %v710_v9, %v708_v10  ;;  %v714_v34 = vadd.f32 %v710_v9, %v709_v11  ;;  %v711_v36 = vadd.f32 %v710_v9, %v706_v12  ;;  %v712_v19 = vadd.f32 %v710_v9, %v707_v13 }
 0x313   :  { %v717_v27 = vmax.f32 %v713_v33, 0.0  ;;  %v718_v32 = vmax.f32 %v714_v34, 0.0  ;;  %v715_v18 = vmax.f32 %v711_v36, 0.0  ;;  %v716_v37 = vmax.f32 %v712_v19, 0.0 }
 0x315   :  { %v721_v48 = vpack.c.bf16 %v717_v27, %v717_v27  ;;  %v722_v43 = vpack.c.bf16 %v718_v32, %v718_v32  ;;  %v719_v62 = vpack.c.bf16 %v715_v18, %v715_v18  ;;  %v720_v44 = vpack.c.bf16 %v716_v37, %v716_v37 }
 0x317   :  { %v729_v47 = vunpack.c.l.b16 %v721_v48  ;;  %v730_v45 = vunpack.c.l.b16 %v722_v43  ;;  %v727_v50 = vunpack.c.l.b16 %v719_v62  ;;  %v728_v51 = vunpack.c.l.b16 %v720_v44 }
 0x319   :  { %v732_v46 = vpack.c.b16 %v730_v45, %v729_v47  ;;  %v1907_v56 = vpack.c.b16 %v728_v51, %v727_v50 }
 0x31b   :  { %741 = vmatpush.bf16.msra.mxu2 %v732_v46  ;;  %764 = vmatpush.bf16.msrb.mxu3 %v732_v46 }
 0x31c   :  { %1029 = vmatmul.bf16.vlgmr.msrb.gmra.mxu1 %v732_v46 }
 0x31f   :  { %742 = vmatpush.bf16.msra.mxu2 %v1907_v56  ;;  %765 = vmatpush.bf16.msrb.mxu3 %v1907_v56 }
 0x322   :  { %1311 = vmatmul.msk.bf16.vlgmr.msra.gmra.mxu2 %vm211_vm1, %v1584_v20  ;;  %1313 = vmatmul.msk.bf16.vlgmr.msrb.gmra.mxu3 %vm211_vm1, %v1610_v25  ;;  %v1446_v20 = vld [vmem:[%s2027_s9 + $0x30] sm:$0xff]  ;;  %v1445_v25 = vld [vmem:[%s2027_s9 + $0x28] sm:$0xff] }
 0x323   :  { %1035 = vmatpush.bf16.msrb.mxu2 %v1463_v55  ;;  %1077 = vmatpush.msra.mxu3 %v1721_v14  ;;  %v1444_v14 = vld [vmem:[%s2027_s9 + $0x20] sm:$0xff] }
 0x324   :  { %998 = vmatpush.bf16.msra.mxu0 %v1446_v20 }
 0x325   :  { %1078 = vmatpush.msra.mxu3 %v1727_v15  ;;  %v1460_v15 = vld [vmem:[%s2027_s9 + $0xa0] sm:$0xff] }
 0x327   :  { %1079 = vmatpush.msra.mxu3 %v1733_v53  ;;  %v1443_v53 = vld [vmem:[%s2027_s9 + $0x18] sm:$0xff] }
 0x328   :  { %999 = vmatpush.bf16.msra.mxu0 %v1445_v25 }
 0x329   :  { %1080 = vmatpush.msra.mxu3 %v1739_v54  ;;  %v1459_v54 = vld [vmem:[%s2027_s9 + $0x98] sm:$0xff] }
 0x32b   :  { %1081 = vmatpush.msra.mxu3 %v1745_v57  ;;  %v1442_v57 = vld [vmem:[%s2027_s9 + $0x10] sm:$0xff] }
 0x32c   :  { %1000 = vmatpush.bf16.msra.mxu0 %v1444_v14 }
 0x32d   :  { %1082 = vmatpush.msra.mxu3 %v1751_v16  ;;  %v1458_v16 = vld [vmem:[%s2027_s9 + $0x90] sm:$0xff] }
 0x32f   :  { %1083 = vmatpush.msra.mxu3 %v1757_v17  ;;  %v1441_v17 = vld [vmem:[%s2027_s9 + $0x8] sm:$0xff] }
 0x330   :  { %1001 = vmatpush.bf16.msra.mxu0 %v1443_v53 }
 0x331   :  { %1084 = vmatpush.msra.mxu3 %v1763_v22  ;;  %v1457_v22 = vld [vmem:[%s2027_s9 + $0x88] sm:$0xff] }
 0x332   :  { %1312 = vmatmul.msk.bf16.gmra.mxu2 %vm211_vm1, %v1603_v24  ;;  %1314 = vmatmul.msk.bf16.gmra.mxu3 %vm211_vm1, %v1617_v26  ;;  %v1462_v24 = vld [vmem:[%s2027_s9 + $0xb0] sm:$0xff]  ;;  %v1461_v26 = vld [vmem:[%s2027_s9 + $0xa8] sm:$0xff] }
 0x333   :  { %1085 = vmatpush.msra.mxu3 %v1769_v23  ;;  %1036 = vmatpush.bf16.msrb.mxu2 %v1462_v24  ;;  %v1440_v23 = vld [vmem:[%s2027_s9] sm:$0xff] }
 0x334   :  { %1002 = vmatpush.bf16.msra.mxu0 %v1442_v57 }
 0x335   :  { %1086 = vmatpush.msra.mxu3 %v1775_v28  ;;  %v1456_v28 = vld [vmem:[%s2027_s9 + $0x80] sm:$0xff] }
 0x337   :  { %1087 = vmatpush.msra.mxu3 %v1781_v29  ;;  %1037 = vmatpush.bf16.msrb.mxu2 %v1461_v26 }
 0x338   :  { %1003 = vmatpush.bf16.msra.mxu0 %v1441_v17 }
 0x339   :  { %1088 = vmatpush.msra.mxu3 %v1786_v30 }
 0x33b   :  { %1089 = vmatpush.msra.mxu3 %v1792_v31  ;;  %1038 = vmatpush.bf16.msrb.mxu2 %v1460_v15 }
 0x33c   :  { %1004 = vmatpush.bf16.msra.mxu0 %v1440_v23 }
 0x33d   :  { %1090 = vmatpush.msra.mxu3 %v1798_v35 }
 0x33f   :  { %1091 = vmatpush.msra.mxu3 %v1804_v38  ;;  %1039 = vmatpush.bf16.msrb.mxu2 %v1459_v54 }
 0x340   :  { %1016 = vmatpush.bf16.msrb.mxu0 %v1844_v41 }
 0x341   :  { %1092 = vmatpush.msra.mxu3 %v1810_v39 }
 0x343   :  { %1147 = vmatpush.msrb.mxu3 %v1838_v40  ;;  %1040 = vmatpush.bf16.msrb.mxu2 %v1458_v16 }
 0x344   :  { %1017 = vmatpush.bf16.msrb.mxu0 %v1850_v42 }
 0x347   :  { %1041 = vmatpush.bf16.msrb.mxu2 %v1457_v22 }
 0x348   :  { %1018 = vmatpush.bf16.msrb.mxu0 %v1856_v49 }
 0x34b   :  { %1042 = vmatpush.bf16.msrb.mxu2 %v1456_v28 }
 0x34c   :  { %1019 = vmatpush.bf16.msrb.mxu0 %v1862_v52 }
 0x350   :  { %1020 = vmatpush.bf16.msrb.mxu0 %v1876_v3 }
 0x354   :  { %1021 = vmatpush.bf16.msrb.mxu0 %v1882_v4 }
 0x358   :  { %1022 = vmatpush.bf16.msrb.mxu0 %v1888_v5 }
 0x35c   :  { %1023 = vmatpush.bf16.msrb.mxu0 %v1894_v6 }
 0x399   :  { %v1030_v21 = vpop.f32.mrf.mxu1 }
 0x3a1   :  { %v1032_v44 = vpop.f32.mrf.mxu1 }
 0x3a5   :  { %v744_v29 = vpop.f32.mrf.mxu2  ;;  %v767_v30 = vpop.f32.mrf.mxu3 }
 0x3a6   :  { %v777_v31 = vpack.c.bf16 %v767_v30, %v767_v30  ;;  %v754_v35 = vpack.c.bf16 %v744_v29, %v744_v29 }
 0x3a8   :  { %v797_v40 = vunpack.c.l.b16 %v777_v31  ;;  %v785_v42 = vunpack.c.l.b16 %v754_v35 }
 0x3ad   :  { %v746_v38 = vpop.f32.mrf.mxu2  ;;  %v769_v39 = vpop.f32.mrf.mxu3 }
 0x3ae   :  { %v755_v41 = vpack.c.bf16 %v746_v38, %v746_v38  ;;  %v778_v58 = vpack.c.bf16 %v769_v39, %v769_v39 }
 0x3b0   :  { %v786_v49 = vunpack.c.l.b16 %v755_v41  ;;  %v798_v52 = vunpack.c.l.b16 %v778_v58 }
 0x3b2   :  { %v789_v59 = vpack.c.b16 %v786_v49, %v785_v42  ;;  %v801_v60 = vpack.c.b16 %v798_v52, %v797_v40 }
 0x3b4   :  { %1005 = vmatmul.bf16.vlgmr.msra.gmra.mxu0 %v789_v59  ;;  %1043 = vmatmul.bf16.vlgmr.msrb.gmra.mxu2 %v801_v60 }
 0x3b5   :  { %v749_v61 = vpop.f32.mrf.mxu2  ;;  %v772_v63 = vpop.f32.mrf.mxu3 }
 0x3b6   :  { %v779_v0 = vpack.c.bf16 %v772_v63, %v772_v63  ;;  %v756_v1 = vpack.c.bf16 %v749_v61, %v749_v61 }
 0x3b8   :  { %v799_v4 = vunpack.c.l.b16 %v779_v0  ;;  %v787_v8 = vunpack.c.l.b16 %v756_v1 }
 0x3bd   :  { %v751_v2 = vpop.f32.mrf.mxu2  ;;  %v774_v3 = vpop.f32.mrf.mxu3 }
 0x3be   :  { %v757_v5 = vpack.c.bf16 %v751_v2, %v751_v2  ;;  %v780_v7 = vpack.c.bf16 %v774_v3, %v774_v3 }
 0x3c0   :  { %v788_v9 = vunpack.c.l.b16 %v757_v5  ;;  %v800_v10 = vunpack.c.l.b16 %v780_v7  ;;  %v1104_v5 = vld [vmem:[%s2030_s10] sm:$0x1] }
 0x3c2   :  { %v790_v6 = vpack.c.b16 %v788_v9, %v787_v8  ;;  %v802_v11 = vpack.c.b16 %v800_v10, %v799_v4  ;;  %v1122_v9 = vld [vmem:[%s2031_s11] sm:$0x1] }
 0x3c4   :  { %1010 = vmatmul.bf16.gmra.mxu0 %v790_v6  ;;  %1048 = vmatmul.bf16.gmra.mxu2 %v802_v11 }
 0x3d4   :  { %1024 = vmatmul.bf16.vlgmr.msrb.gmra.mxu0 %v1907_v56 }
 0x431   :  { %v1006_v12 = vpop.f32.mrf.mxu0 }
 0x437   :  { %v1044_v33 = vpop.f32.mrf.mxu2 }
 0x439   :  { %v1008_v13 = vpop.f32.mrf.mxu0 }
 0x43f   :  { %v1046_v36 = vpop.f32.mrf.mxu2 }
 0x441   :  { %v1011_v34 = vpop.f32.mrf.mxu0 }
 0x442   :  { %v1031_v48 = vadd.f32 %v1030_v21, %v1011_v34 }
 0x447   :  { %v1049_v27 = vpop.f32.mrf.mxu2 }
 0x448   :  { %v1989_v45 = vadd.f32 %v1049_v27, %v1031_v48 }
 0x449   :  { %v1013_v19 = vpop.f32.mrf.mxu0 }
 0x44a   :  { %v1033_v46 = vadd.f32 %v1032_v44, %v1013_v19  ;;  %v1065_v24 = vmul.f32 %v1989_v45, %v1989_v45 }
 0x44f   :  { %v1051_v47 = vpop.f32.mrf.mxu2 }
 0x450   :  { %v1052_v51 = vadd.f32 %v1051_v47, %v1033_v46 }
 0x451   :  { %v1025_v32 = vpop.f32.mrf.mxu0 }
 0x452   :  { %v1026_v18 = vadd.f32 %v1025_v32, %v1006_v12  ;;  %v1066_v14 = vmul.f32 %v1052_v51, %v1052_v51 }
 0x454   :  { %v1987_v43 = vadd.f32 %v1044_v33, %v1026_v18 }
 0x456   :  { %v1063_v55 = vmul.f32 %v1987_v43, %v1987_v43 }
 0x459   :  { %v1027_v37 = vpop.f32.mrf.mxu0 }
 0x45a   :  { %v1028_v62 = vadd.f32 %v1027_v37, %v1008_v13 }
 0x45c   :  { %v1047_v50 = vadd.f32 %v1046_v36, %v1028_v62 }
 0x45e   :  { %v1054_v56 = vadd.f32 %v1047_v50, %v1987_v43  ;;  %v1064_v20 = vmul.f32 %v1047_v50, %v1047_v50 }
 0x460   :  { %v1055_v25 = vadd.f32 %v1054_v56, %v1989_v45  ;;  %v1067_v26 = vadd.f32 %v1064_v20, %v1063_v55 }
 0x462   :  { %v1056_v15 = vadd.f32 %v1055_v25, %v1052_v51  ;;  %v1068_v53 = vadd.f32 %v1067_v26, %v1065_v24 }
 0x464   :  { %v1057_v54 = vrot.slane %v1056_v15, 4  ;;  %v1069_v57 = vadd.f32 %v1068_v53, %v1066_v14 }
 0x466   :  { %v1058_v16 = vadd.f32 %v1057_v54, %v1056_v15  ;;  %v1070_v17 = vrot.slane %v1069_v57, 4 }
 0x468   :  { %v1059_v22 = vrot.slane %v1058_v16, 2  ;;  %v1071_v23 = vadd.f32 %v1070_v17, %v1069_v57 }
 0x46a   :  { %v1060_v28 = vadd.f32 %v1059_v22, %v1058_v16  ;;  %v1072_v29 = vrot.slane %v1071_v23, 2 }
 0x46c   :  { %v1061_v30 = vrot.slane %v1060_v28, 1  ;;  %v1073_v31 = vadd.f32 %v1072_v29, %v1071_v23 }
 0x46e   :  { %v1074_v35 = vrot.slane %v1073_v31, 1  ;;  %v1062_v38 = vadd.f32 %v1061_v30, %v1060_v28 }
 0x470   :  { %v1075_v39 = vadd.f32 %v1074_v35, %v1073_v31 }
 0x472   :  { %v1076_v40 = vsel %vm610_vm4, %v1062_v38, %v1075_v39 }
 0x473   :  { %1093 = vmatmul.f32.vlgmr.msra.gmra.mxu3 %v1076_v40 }
 0x4f6   :  { %v1094_v41 = vpop.f32.mrf.mxu3 }
 0x4f7   :  { %v1097_v58 = vmul.f32 0.001953125, %v1094_v41 }
 0x4f9   :  { %v1098_v42 = vmul.f32 %v1097_v58, %v1097_v58 }
 0x4fb   :  { %v1100_v49 = vrot.slane %v1098_v42, 7 }
 0x4fd   :  { %v1102_v52 = vsub.f32 %v1097_v58, %v1100_v49 }
 0x4ff   :  { %v1103_v59 = vmax.f32 %v1102_v52, 0.0 }
 0x501   :  { %v1105_v60 = vadd.f32 1e-05, %v1103_v59 }
 0x503   :  { %1477 = vrsqrt.f32 %v1105_v60  ;;  %vm1112_vm10 = vweird.f32 %v1105_v60 }
 0x509   :  { %v1478_v61 = vpop.eup %1477 }
 0x50a   :  { %v1107_v63 = vmul.f32 %v1478_v61, %v1105_v60  ;;  %vm1113_vm9 = vweird.f32 %v1478_v61 }
 0x50b   :  { %vm1114_vm11 = vmor %vm1112_vm10, %vm1113_vm9 }
 0x50c   :  { %v1108_v0 = vmul.f32 %v1478_v61, %v1107_v63 }
 0x50e   :  { %v1109_v1 = vmul.f32 0.5, %v1108_v0 }
 0x510   :  { %v1110_v2 = vsub.f32 1.5, %v1109_v1 }
 0x512   :  { %v1111_v3 = vmul.f32 %v1478_v61, %v1110_v2 }
 0x514   :  { %v1115_v4 = vsel %vm1114_vm11, %v1478_v61, %v1111_v3 }
 0x515   :  { %1117 = vst [vmem:[#allocation1] sm:$0xff] %v1115_v4 }
 0x51c   :  { %v1119_v7 = vld [vmem:[#allocation1 + $0x1] ss:$9 sm:$0xff] }
 0x51d   :  { %v1121_v8 = vmul.f32 %v1119_v7, %v1104_v5 }
 0x51f   :  { %v1123_v10 = vmul.f32 %v1121_v8, %v1097_v58 }
 0x521   :  { %v1124_v6 = vsub.f32 %v1122_v9, %v1123_v10 }
 0x523   :  { %v1126_v11 = vperm.slane %v1124_v6, 0 }
 0x525   :  { %v1128_v12 = vsel %vm610_vm4, %v1121_v8, %v1126_v11 }
 0x526   :  { %1411 = vmatmul.msk.f32.vlgmr.msrb.gmra.mxu3 %vm681_vm8, %v1128_v12 }
 0x5a9   :  { %v1149_v13 = vpop.f32.mrf.mxu3 }
 0x5aa   :  { %v1152_v33 = vperm.slane %v1149_v13, 0  ;;  %v1157_v34 = vperm.slane %v1149_v13, 1 }
 0x5ac   :  { %v1153_v36 = vmul.f32 %v1152_v33, %v1987_v43  ;;  %v1154_v19 = vmul.f32 %v1152_v33, %v1047_v50  ;;  %v1155_v21 = vmul.f32 %v1152_v33, %v1989_v45  ;;  %v1156_v27 = vmul.f32 %v1152_v33, %v1052_v51 }
 0x5ae   :  { %v1158_v32 = vadd.f32 %v1157_v34, %v1153_v36  ;;  %v1159_v18 = vadd.f32 %v1157_v34, %v1154_v19  ;;  %v1160_v37 = vadd.f32 %v1157_v34, %v1155_v21  ;;  %v1161_v48 = vadd.f32 %v1157_v34, %v1156_v27 }
 0x5b0   :  { %v1162_v62 = vmax.f32 %v1158_v32, 0.0  ;;  %v1163_v44 = vmax.f32 %v1159_v18, 0.0  ;;  %v1164_v47 = vmax.f32 %v1160_v37, 0.0  ;;  %v1165_v46 = vmax.f32 %v1161_v48, 0.0 }
 0x5b2   :  { %1166 = vst [vmem:[%s2032_s12] sm:$0xff] %v1162_v62 }
 0x5b3   :  { %1167 = vst [vmem:[%s2032_s12 + $0x8] sm:$0xff] %v1163_v44 }
 0x5b4   :  { %1168 = vst [vmem:[%s2032_s12 + $0x10] sm:$0xff] %v1164_v47 }
 0x5b5   :  { %1169 = vst [vmem:[%s2032_s12 + $0x18] sm:$0xff] %v1165_v46 }

</bundles_post_ra>
